<compile_context>
chip_gen: v7x
topology: tpu7x:2x2x1
jax: 0.10.0
libtpu: 0.0.40
codegen_flags: <defaults>
</compile_context>

<pallas_src>
import functools

import numpy as np
import jax
import jax.numpy as jnp
from jax import lax
from jax.experimental import pallas as pl
from jax.experimental.pallas import tpu as pltpu

QUANTILES = (0.1, 0.5, 0.9)  # deterministic, fixed quantile levels


def _pinball_kernel(labels_ref, preds_ref, qv_ref, expand_ref, out_ref, acc_ref,
                    *, inv_n, batch, tile_b, needs_mask):
    step = pl.program_id(0)

    @pl.when(step == 0)
    def _init():
        acc_ref[...] = jnp.zeros_like(acc_ref)

    y = labels_ref[...].astype(jnp.float32)        # (TB, F)
    p = preds_ref[...].astype(jnp.float32)         # (TB, F*Q)
    qv = qv_ref[...]                               # (1, F*Q), qv[j] = q[j % Q]

    # Expand labels across the interleaved quantile lanes on the (idle) MXU:
    # y_rep[b, f*Q + q] = y[b, f].  expand_ref is a tiny constant (F, F*Q).
    y_rep = jnp.dot(y, expand_ref[...], preferred_element_type=jnp.float32)

    diff = y_rep - p
    loss = jnp.maximum(qv * diff, (qv - 1.0) * diff)   # (TB, F*Q), pure VPU

    if needs_mask:
        # Only emitted when B % tile_b != 0: zero out padded rows of the last
        # (partial) tile before accumulating.  Garbage rows may contain NaN/Inf;
        # jnp.where selects, so nothing propagates.
        row = lax.broadcasted_iota(jnp.int32, (tile_b, 1), 0) + step * tile_b
        loss = jnp.where(row < batch, loss, 0.0)

    acc_ref[...] += loss                               # running sum stays on VPU

    @pl.when(step == pl.num_programs(0) - 1)
    def _finalize():
        # Single cross-lane (XLU) reduction + fold of 1/n, only once per call.
        out_ref[0, 0] = jnp.sum(acc_ref[...]) * inv_n


def _pick_tile_rows(batch, row_bytes, target_bytes=4 << 20):
    """Row-tile choice: full batch when tiny, otherwise an 8-aligned tile sized
    to ~target_bytes of streamed input per step (biggest reasonable block)."""
    if batch <= 8:
        return batch                       # single block; dims equal full extents
    cap = max(8, min(batch, target_bytes // max(row_bytes, 1)))
    return max(8, (cap // 8) * 8)          # multiple of 8 (sublane alignment)


def quantile_loss(labels, predictions, quantiles=QUANTILES):
    """labels: (B, F); predictions: (B, F, Q) -> scalar mean pinball loss."""
    B, F = labels.shape
    Q = len(quantiles)
    assert predictions.shape == (B, F, Q)
    FQ = F * Q

    # Free reshape: contiguous, no HBM data movement.
    preds2d = predictions.reshape(B, FQ)

    # Tiny compile-time aux tensors; constant index_map keeps them VMEM-resident.
    q_np = np.asarray(quantiles, dtype=np.float32)
    qv = jnp.asarray(np.tile(q_np, F).reshape(1, FQ))                        # (1, FQ)
    expand = jnp.asarray(np.repeat(np.eye(F, dtype=np.float32), Q, axis=1))  # (F, FQ)

    in_itemsize = jnp.dtype(predictions.dtype).itemsize
    lbl_itemsize = jnp.dtype(labels.dtype).itemsize
    row_bytes = F * lbl_itemsize + FQ * in_itemsize
    tile_b = _pick_tile_rows(B, row_bytes)
    n_blocks = pl.cdiv(B, tile_b)
    needs_mask = (B % tile_b) != 0

    # VMEM budget: double-buffered input tiles + resident aux + f32 accumulator.
    labels_tile = tile_b * F * lbl_itemsize
    preds_tile = tile_b * FQ * in_itemsize
    aux_bytes = (FQ + F * FQ) * 4
    acc_bytes = tile_b * FQ * 4
    vmem_need = 2 * (labels_tile + preds_tile + aux_bytes) + acc_bytes
    vmem_limit = int(min(48 * 1024 * 1024, max(2 * vmem_need, 16 * 1024 * 1024)))

    n_elems = B * F * Q
    cost = pl.CostEstimate(
        flops=5 * n_elems + 2 * B * F * FQ,
        transcendentals=0,
        bytes_accessed=(labels.size * lbl_itemsize
                        + predictions.size * in_itemsize + aux_bytes + 4),
    )

    kernel = functools.partial(
        _pinball_kernel,
        inv_n=float(1.0 / n_elems),
        batch=B,
        tile_b=tile_b,
        needs_mask=needs_mask,
    )

    out = pl.pallas_call(
        kernel,
        out_shape=jax.ShapeDtypeStruct((1, 1), jnp.float32),
        grid_spec=pltpu.PrefetchScalarGridSpec(
            num_scalar_prefetch=0,
            grid=(n_blocks,),
            in_specs=[
                pl.BlockSpec((tile_b, F), lambda i: (i, 0)),    # labels tile
                pl.BlockSpec((tile_b, FQ), lambda i: (i, 0)),   # prediction tile
                pl.BlockSpec((1, FQ), lambda i: (0, 0)),        # quantile lane vec
                pl.BlockSpec((F, FQ), lambda i: (0, 0)),        # label expander
            ],
            out_specs=pl.BlockSpec((1, 1), lambda i: (0, 0),
                                   memory_space=pltpu.SMEM),
            scratch_shapes=[pltpu.VMEM((tile_b, FQ), jnp.float32)],
        ),
        compiler_params=pltpu.CompilerParams(
            dimension_semantics=("arbitrary",),   # grid axis is a reduction
            vmem_limit_bytes=vmem_limit,
        ),
        cost_estimate=cost,
    )(labels, preds2d, qv, expand)
    return out[0, 0]


def _reference_loss(labels, predictions, quantiles=QUANTILES):
    q = jnp.asarray(quantiles, jnp.float32)                    # (Q,)
    diff = labels.astype(jnp.float32)[..., None] - predictions.astype(jnp.float32)
    loss = jnp.maximum(q * diff, (q - 1.0) * diff)
    return jnp.mean(loss)


if __name__ == "__main__":
    forecast_length = 8
    batch = 2
    num_q = len(QUANTILES)

    key = jax.random.PRNGKey(0)
    k1, k2 = jax.random.split(key)
    labels = jax.random.normal(k1, (batch, forecast_length), dtype=jnp.float32)
    predictions = jax.random.normal(
        k2, (batch, forecast_length, num_q), dtype=jnp.float32)

    loss = quantile_loss(labels, predictions)
    loss = jax.block_until_ready(loss)

    ref = _reference_loss(labels, predictions)
    assert jnp.allclose(loss, ref, rtol=1e-5, atol=1e-5), (loss, ref)

    print("KERNEL_OK")
</pallas_src>

<mosaic_0001>
module attributes {stable_mosaic.version = 11 : i64} {
  func.func @_pinball_kernel(%arg0: i32, %arg1: memref<2x8xf32, #tpu.memory_space<vmem>>, %arg2: memref<2x24xf32, #tpu.memory_space<vmem>>, %arg3: memref<1x24xf32, #tpu.memory_space<vmem>>, %arg4: memref<8x24xf32, #tpu.memory_space<vmem>>, %arg5: memref<1x1xf32, #tpu.memory_space<smem>>, %arg6: memref<2x24xf32, #tpu.memory_space<vmem>>) attributes {dimension_semantics = [#tpu.dimension_semantics<arbitrary>], iteration_bounds = array<i64: 1>, scalar_prefetch = 0 : i64, scratch_operands = 1 : i64, tpu.core_type = #tpu.core_type<tc>, window_params = [{transform_indices = @transform_0, window_bounds = array<i64: 2, 8>}, {transform_indices = @transform_1, window_bounds = array<i64: 2, 24>}, {pipeline_mode = #tpu.pipeline_mode<synchronous>, transform_indices = @transform_2, window_bounds = array<i64: 1, 24>}, {pipeline_mode = #tpu.pipeline_mode<synchronous>, transform_indices = @transform_3, window_bounds = array<i64: 8, 24>}, {transform_indices = @transform_4, window_bounds = array<i64: 1, 1>}]} {
    %c0_i32 = arith.constant 0 : i32
    %0 = arith.cmpi eq, %arg0, %c0_i32 : i32
    %1 = arith.extui %0 : i1 to i32
    %c0_i32_0 = arith.constant 0 : i32
    %2 = arith.cmpi ne, %1, %c0_i32_0 : i32
    scf.if %2 {
      %cst_15 = arith.constant 0.000000e+00 : f32
      %22 = vector.broadcast %cst_15 : f32 to vector<2x24xf32>
      %c0_16 = arith.constant 0 : index
      %c0_17 = arith.constant 0 : index
      %23 = vector.load %arg6[%c0_16, %c0_17] : memref<2x24xf32, #tpu.memory_space<vmem>>, vector<2x24xf32>
      tpu.vector_store %arg6[%c0_16, %c0_17], %22 {strides = array<i32>} : memref<2x24xf32, #tpu.memory_space<vmem>>, vector<2x24xf32>,
    } else {
    }
    %c0 = arith.constant 0 : index
    %c0_1 = arith.constant 0 : index
    %3 = vector.load %arg1[%c0, %c0_1] : memref<2x8xf32, #tpu.memory_space<vmem>>, vector<2x8xf32>
    %c0_2 = arith.constant 0 : index
    %c0_3 = arith.constant 0 : index
    %4 = vector.load %arg2[%c0_2, %c0_3] : memref<2x24xf32, #tpu.memory_space<vmem>>, vector<2x24xf32>
    %c0_4 = arith.constant 0 : index
    %c0_5 = arith.constant 0 : index
    %5 = vector.load %arg3[%c0_4, %c0_5] : memref<1x24xf32, #tpu.memory_space<vmem>>, vector<1x24xf32>
    %c0_6 = arith.constant 0 : index
    %c0_7 = arith.constant 0 : index
    %6 = vector.load %arg4[%c0_6, %c0_7] : memref<8x24xf32, #tpu.memory_space<vmem>>, vector<8x24xf32>
    %cst = arith.constant dense<0.000000e+00> : vector<2x24xf32>
    %7 = tpu.matmul %3, %6, %cst {dimension_numbers = #tpu.dot_dimension_numbers<[1], [0], [0], [1], [0, 0, 1, 1], [], []>} : vector<2x8xf32>, vector<8x24xf32>, vector<2x24xf32> -> vector<2x24xf32>
    %8 = arith.subf %7, %4 : vector<2x24xf32>
    %9 = vector.broadcast %5 : vector<1x24xf32> to vector<2x24xf32>
    %10 = arith.mulf %9, %8 : vector<2x24xf32>
    %cst_8 = arith.constant 1.000000e+00 : f32
    %11 = vector.broadcast %cst_8 : f32 to vector<1x24xf32>
    %12 = arith.subf %5, %11 : vector<1x24xf32>
    %13 = vector.broadcast %12 : vector<1x24xf32> to vector<2x24xf32>
    %14 = arith.mulf %13, %8 : vector<2x24xf32>
    %15 = arith.maximumf %10, %14 : vector<2x24xf32>
    %c0_9 = arith.constant 0 : index
    %c0_10 = arith.constant 0 : index
    %16 = vector.load %arg6[%c0_9, %c0_10] : memref<2x24xf32, #tpu.memory_space<vmem>>, vector<2x24xf32>
    %17 = arith.addf %16, %15 : vector<2x24xf32>
    %c0_11 = arith.constant 0 : index
    %c0_12 = arith.constant 0 : index
    %18 = vector.load %arg6[%c0_11, %c0_12] : memref<2x24xf32, #tpu.memory_space<vmem>>, vector<2x24xf32>
    tpu.vector_store %arg6[%c0_11, %c0_12], %17 {strides = array<i32>} : memref<2x24xf32, #tpu.memory_space<vmem>>, vector<2x24xf32>,
    %c0_i32_13 = arith.constant 0 : i32
    %19 = arith.cmpi eq, %arg0, %c0_i32_13 : i32
    %20 = arith.extui %19 : i1 to i32
    %c0_i32_14 = arith.constant 0 : i32
    %21 = arith.cmpi ne, %20, %c0_i32_14 : i32
    scf.if %21 {
      %c0_15 = arith.constant 0 : index
      %c0_16 = arith.constant 0 : index
      %22 = vector.load %arg6[%c0_15, %c0_16] : memref<2x24xf32, #tpu.memory_space<vmem>>, vector<2x24xf32>
      %23 = vector.shape_cast %22 : vector<2x24xf32> to vector<1x2x24xf32>
      %cst_17 = arith.constant dense<0.000000e+00> : vector<1xf32>
      %24 = vector.multi_reduction <add>, %23, %cst_17 [1, 2] : vector<1x2x24xf32> to vector<1xf32>
      %25 = vector.shape_cast %24 : vector<1xf32> to vector<1x1x1xf32>
      %26 = vector.extract %25[0, 0, 0] : f32 from vector<1x1x1xf32>
      %cst_18 = arith.constant 0.020833334 : f32
      %27 = arith.mulf %26, %cst_18 : f32
      %c0_19 = arith.constant 0 : index
      %c0_20 = arith.constant 0 : index
      %28 = memref.load %arg5[%c0_19, %c0_20] : memref<1x1xf32, #tpu.memory_space<smem>>
      memref.store %27, %arg5[%c0_19, %c0_20] : memref<1x1xf32, #tpu.memory_space<smem>>
    } else {
    }
    return
  }
  func.func @transform_0(%arg0: i32) -> (i32, i32) {
    %c0_i32 = arith.constant 0 : i32
    %c0_i32_0 = arith.constant 0 : i32
    return %arg0, %c0_i32 : i32, i32
  }
  func.func @transform_1(%arg0: i32) -> (i32, i32) {
    %c0_i32 = arith.constant 0 : i32
    %c0_i32_0 = arith.constant 0 : i32
    return %arg0, %c0_i32 : i32, i32
  }
  func.func @transform_2(%arg0: i32) -> (i32, i32) {
    %c0_i32 = arith.constant 0 : i32
    %c0_i32_0 = arith.constant 0 : i32
    %c0_i32_1 = arith.constant 0 : i32
    return %c0_i32, %c0_i32_0 : i32, i32
  }
  func.func @transform_3(%arg0: i32) -> (i32, i32) {
    %c0_i32 = arith.constant 0 : i32
    %c0_i32_0 = arith.constant 0 : i32
    %c0_i32_1 = arith.constant 0 : i32
    return %c0_i32, %c0_i32_0 : i32, i32
  }
  func.func @transform_4(%arg0: i32) -> (i32, i32) {
    %c0_i32 = arith.constant 0 : i32
    %c0_i32_0 = arith.constant 0 : i32
    %c0_i32_1 = arith.constant 0 : i32
    return %c0_i32, %c0_i32_0 : i32, i32
  }
}

</mosaic_0001>

<bundles_post_ra>
// kernel: tpu_custom_call.1
= control target key start
LH: loop header
LB: loop body
LE: loop exit
PB: predicated region body
PF: predicated region fallthrough
CT: control target
= control target key end

     0   :  { %9 = vsyncpa [#allocation4], 0  ;;  %s282_s0 = inlined_call_operand.hbm [shape: f32[2,8], index: 0, kind: input, shape index: {}]   ;;  %s283_s1 = inlined_call_operand.vmem [shape: f32[2,24], index: 1, kind: input, shape index: {}]   ;;  %s284_s2 = inlined_call_operand.vmem [shape: f32[1,24], index: 2, kind: input, shape index: {}]   ;;  %s285_s3 = inlined_call_operand.vmem [shape: f32[8,24], index: 3, kind: input, shape index: {}]   ;;  %s286_s4 = inlined_call_operand.hbm [shape: f32[1,1], index: 4, kind: output, shape index: {}]  }
   0x1   :  { %10 = vsyncpa [#allocation5], 0  ;;  %s217_s15 = smov [#allocation3]   ;;  %s181_s19 = scalar_lea.hbm %s282_s0, 32 }
   0x2   :  { %s17_s16 = sshll.u32 %s217_s15, 4  ;;  %p182_p0 = scmp.ne.s32.totalorder %s282_s0, %s181_s19  ;;  %s18_s16 = int_to_ptr.vmem [resolvable:$true] %s17_s16 }
   0x3   :  { %p185_p1 = scmp.lt.u32.totalorder %s181_s19, %s282_s0 }
   0x5   :  { %p187_p2 = pnand %p185_p1, %p182_p0 }
   0x7   :  { %190 = shalt.err (!%p187_p2)
}
   0x8   :  { %s191_s24 = scalar_lea.vmem %s18_s16, 32  ;;  %p196_p4 = scmp.lt.s32.totalorder %s18_s16, %s18_s16 }
   0x9   :  { %p192_p3 = scmp.ne.s32.totalorder %s18_s16, %s191_s24  ;;  %p197_p5 = scmp.lt.s32.totalorder %s191_s24, %s191_s24 }
   0xb   :  { %p198_p6 = por %p197_p5, %p196_p4 }
   0xd   :  { %p199_p7 = pnand %p198_p6, %p192_p3 }
   0xf   :  { %202 = shalt.err (!%p199_p7)
}
  0x10   :  { %20 = dma.hbm_to_vmem [thread:$0]  %s282_s0, 32, %s18_s16, [#allocation4]  }
  0x11   :  { %213 = dma.done.wait [#allocation4], 32  }
  0x12   :  { %214 = vsyncadd [#allocation4], 4294967264  ;;  %v218_v0 = vmov 0.0   ;;  %vm219_vm0 = vmmov 0   ;;  %vm40_vm1 = vcmask 64512   ;;  %v39_v1 = vld [vmem:[%s285_s3] sm:$0xff]  ;;  %v116_v3 = vlaneseq }
  0x13   :  { %170 = vmatprep.subr.mxu0 %v218_v0  ;;  %172 = vmatprep.mubr.msk.f32.mxu0 %vm219_vm0, %v218_v0  ;;  %v36_v2 = vld [vmem:[#allocation3] sm:$0x3]  ;;  %vm34_vm2 = vcmask 189440   ;;  %v38_v5 = vld [vmem:[%s284_s2] sm:$0x1]  ;;  %s203_s7 = scalar_lea.hbm %s286_s4, 16 }
  0x14   :  { %171 = vmatpush3.msra.mxu0 %v39_v1  ;;  %35 = vst.msk [vmem:[#allocation2] sm:$0x3] %vm34_vm2, %v218_v0  ;;  %v117_v4 = vshrl.u32 %v116_v3, 7  ;;  %v167_v7 = vadd.f32 -1.0, %v38_v5  ;;  %v37_v8 = vld [vmem:[%s283_s1] sm:$0x3]  ;;  %p204_p8 = scmp.ne.s32.totalorder %s286_s4, %s203_s7  ;;  %p207_p9 = scmp.lt.u32.totalorder %s203_s7, %s286_s4 }
  0x15   :  { %173 = vmatmul.mubr.msk.f32.vlgmr.msra.gmra.mrb[0].mxu0 %vm40_vm1, %v36_v2 }
  0x16   :  { %v118_v6 = vsub.s32 0, %v117_v4  ;;  %p209_p10 = pnand %p207_p9, %p204_p8 }
  0x18   :  { %v119_v9 = vrot.slane %v38_v5, %v118_v6  ;;  %v127_v10 = vrot.slane %v167_v7, %v118_v6 }
  0x1b   :  { %v131_v16 = vld [vmem:[#allocation2] sm:$0x3] }
  0xe8   :  { %v110_v11 = vpop.f32.mrb[0].mxu0 }
  0xe9   :  { %v114_v12 = vsub.f32 %v110_v11, %v37_v8  ;;  %v174_v13 = vpop.f32.mrb[1].mxu0 }
  0xeb   :  { %v121_v14 = vmul.f32 %v119_v9, %v114_v12  ;;  %v129_v15 = vmul.f32 %v127_v10, %v114_v12 }
  0xed   :  { %v130_v17 = vmax.f32 %v121_v14, %v129_v15 }
  0xef   :  { %v132_v18 = vadd.f32 %v131_v16, %v130_v17 }
  0xf1   :  { %134 = vst.msk [vmem:[#allocation2] sm:$0x3] %vm34_vm2, %v132_v18 }
  0xf8   :  { %v138_v19 = vld [vmem:[#allocation2] sm:$0x3] }
  0xf9   :  { %v139_v20 = vsel %vm34_vm2, %v138_v19, 0.0 }
  0xfa   :  { %140 = vadd.xlane.f32.xlu0 %v139_v20 }
 0x187   :  { %v141_v21 = vpop.xlane.xlu0 %140 }
 0x188   :  { %v142_v22 = vrot.slane %v141_v21, 4 }
 0x18a   :  { %v143_v23 = vadd.f32 %v142_v22, %v141_v21 }
 0x18c   :  { %v144_v24 = vrot.slane %v143_v23, 2 }
 0x18e   :  { %v145_v25 = vadd.f32 %v144_v24, %v143_v23 }
 0x190   :  { %v146_v26 = vrot.slane %v145_v25, 1 }
 0x192   :  { %v147_v27 = vadd.f32 %v146_v26, %v145_v25 }
 0x194   :  { %175 = vpush %v147_v27 }
 0x1c5   :  { %s176_s1 = spop %175 }
 0x1c6   :  { %s149_s2 = smul.f32 0.020833334, %s176_s1 }
 0x1c8   :  { %151 = sst [smem:[#allocation6]] %s149_s2 }
 0x1c9   :  { %212 = shalt.err (!%p209_p10)
}
 0x1ca   :  { %s220_s12 = smov [#allocation6]  }
 0x1cb   :  { %159 = dma.smem_to_hbm %s220_s12, 16, %s286_s4, [#allocation5]  }
 0x1cc   :  { %215 = dma.done.wait [#allocation5], 16  }
 0x1cd   :  { %216 = vsyncadd [#allocation5], 4294967280 }
 0x1ce   :  { %163 = sfence }
 0x1cf   :  { %164 = vsyncpa [#allocation4], 1 }
 0x1d0   :  { %165 = vsyncpa [#allocation5], 1 }

</bundles_post_ra>
